<compile_context>
chip_gen: v7x
topology: tpu7x:2x2x1
jax: 0.10.0
libtpu: 0.0.40
codegen_flags: <defaults>
</compile_context>

<pallas_src>
import functools

import jax
import jax.numpy as jnp
from jax.experimental import pallas as pl
from jax.experimental.pallas import tpu as pltpu

LANE = 128
EPS = 1e-5  # PyTorch BatchNorm1d default


def _pad_to(n, m):
    return ((n + m - 1) // m) * m


# ----------------------------------------------------------------------------
# Fused kernel: 3 x (x @ W' + b' -> ReLU)  then  h @ W_out + b_out.
# Everything (params + activations) is well under 1 MiB, so a single grid point
# with full-array VMEM blocks is the right structure on every TPU generation.
# ----------------------------------------------------------------------------
def fused_mlp_kernel(x_ref,
                     w1_ref, b1_ref,
                     w2_ref, b2_ref,
                     w3_ref, b3_ref,
                     wo_ref, bo_ref,
                     out_ref):
    def layer(h, w_ref, b_ref):
        z = jnp.dot(h, w_ref[...], preferred_element_type=jnp.float32)
        z = z + b_ref[...]                 # folded (Linear bias + BatchNorm) in f32
        return jnp.maximum(z, 0.0)         # ReLU  (Dropout == identity in eval)

    h = x_ref[...]
    h = layer(h, w1_ref, b1_ref)
    h = layer(h, w2_ref, b2_ref)
    h = layer(h, w3_ref, b3_ref)
    y = jnp.dot(h, wo_ref[...], preferred_element_type=jnp.float32) + bo_ref[...]
    out_ref[...] = y.astype(out_ref.dtype)


@functools.partial(jax.jit, static_argnames=("output_size",))
def twl_forward(x, fp, *, output_size):
    B = x.shape[0]
    in_pad = fp["w1"].shape[0]
    n_pad = fp["w_out"].shape[1]

    # Lane-pad the input features (zero padding is exact: padded weight rows are 0).
    x_p = jnp.pad(x, ((0, 0), (0, in_pad - x.shape[1])))

    args = (x_p,
            fp["w1"], fp["b1"],
            fp["w2"], fp["b2"],
            fp["w3"], fp["b3"],
            fp["w_out"], fp["b_out"])

    # Advisory cost hint for XLA's scheduler (matmul flops on padded shapes + bytes).
    flops = 2 * B * sum(w.shape[0] * w.shape[1]
                        for w in (fp["w1"], fp["w2"], fp["w3"], fp["w_out"]))
    bytes_accessed = sum(a.size * a.dtype.itemsize for a in args) + B * n_pad * 4

    full = lambda a: pl.BlockSpec(a.shape, lambda: (0,) * a.ndim)

    y = pl.pallas_call(
        fused_mlp_kernel,
        out_shape=jax.ShapeDtypeStruct((B, n_pad), jnp.float32),
        in_specs=[full(a) for a in args],
        out_specs=pl.BlockSpec((B, n_pad), lambda: (0, 0)),
        cost_estimate=pl.CostEstimate(flops=flops, transcendentals=0,
                                      bytes_accessed=bytes_accessed),
        compiler_params=pltpu.CompilerParams(vmem_limit_bytes=32 * 1024 * 1024),
    )(*args)
    return y[:, :output_size]


# ----------------------------------------------------------------------------
# Parameter construction (mirrors TWLModel.__init__ shapes).
# Raw params keep PyTorch semantics (Linear weight stored transposed as [in, out],
# plus BatchNorm1d gamma/beta/running_mean/running_var); fold_and_pad() produces
# the kernel-side folded + lane-padded parameters.
# ----------------------------------------------------------------------------
def make_raw_params(key, input_size, hidden_sizes, output_size):
    n_hidden = len(hidden_sizes)
    keys = jax.random.split(key, 6 * n_hidden + 2)
    raw = {}
    dims = [input_size] + list(hidden_sizes)
    for i in range(n_hidden):
        j = i + 1
        fan_in, fan_out = dims[i], dims[i + 1]
        k = keys[6 * i: 6 * i + 6]
        raw[f"w{j}"] = jax.random.normal(k[0], (fan_in, fan_out), jnp.float32) * 0.05
        raw[f"b{j}"] = jax.random.normal(k[1], (1, fan_out), jnp.float32) * 0.05
        # Non-trivial eval-mode BatchNorm1d state so the folding is actually exercised.
        raw[f"gamma{j}"] = 1.0 + 0.1 * jax.random.normal(k[2], (1, fan_out), jnp.float32)
        raw[f"beta{j}"] = 0.1 * jax.random.normal(k[3], (1, fan_out), jnp.float32)
        raw[f"mean{j}"] = 0.1 * jax.random.normal(k[4], (1, fan_out), jnp.float32)
        raw[f"var{j}"] = jax.random.uniform(k[5], (1, fan_out), jnp.float32, 0.5, 1.5)
    raw["w_out"] = jax.random.normal(keys[-2], (hidden_sizes[-1], output_size),
                                     jnp.float32) * 0.05
    raw["b_out"] = jax.random.normal(keys[-1], (1, output_size), jnp.float32) * 0.05
    return raw


def fold_and_pad(raw, input_size, hidden_sizes, output_size, eps=EPS, lane=LANE):
    dims = [input_size] + list(hidden_sizes)
    fp = {}
    for i in range(len(hidden_sizes)):
        j = i + 1
        scale = raw[f"gamma{j}"] / jnp.sqrt(raw[f"var{j}"] + eps)      # (1, out)
        shift = raw[f"beta{j}"] - raw[f"mean{j}"] * scale              # (1, out)
        w = raw[f"w{j}"] * scale                                       # fold BN into W
        b = raw[f"b{j}"] * scale + shift                               # fold BN into b
        in_pad, out_pad = _pad_to(dims[i], lane), _pad_to(dims[i + 1], lane)
        fp[f"w{j}"] = jnp.zeros((in_pad, out_pad), jnp.float32).at[:dims[i], :dims[i + 1]].set(w)
        fp[f"b{j}"] = jnp.zeros((1, out_pad), jnp.float32).at[:, :dims[i + 1]].set(b)
    h_pad, n_pad = _pad_to(hidden_sizes[-1], lane), _pad_to(output_size, lane)
    fp["w_out"] = jnp.zeros((h_pad, n_pad), jnp.float32).at[:hidden_sizes[-1], :output_size].set(raw["w_out"])
    fp["b_out"] = jnp.zeros((1, n_pad), jnp.float32).at[:, :output_size].set(raw["b_out"])
    return fp


def twl_reference(x, raw, hidden_sizes, eps=EPS):
    """Plain-JAX reference using the unfolded Linear + BatchNorm1d(eval) + ReLU path."""
    h = x
    for j in range(1, len(hidden_sizes) + 1):
        z = h @ raw[f"w{j}"] + raw[f"b{j}"]
        z = (z - raw[f"mean{j}"]) / jnp.sqrt(raw[f"var{j}"] + eps) \
            * raw[f"gamma{j}"] + raw[f"beta{j}"]
        h = jnp.maximum(z, 0.0)            # Dropout == identity in eval
    return h @ raw["w_out"] + raw["b_out"]


if __name__ == "__main__":
    # Small, consistent shapes: batch=8, input=25, hidden=[32,32,32], output=512.
    B, INPUT, HIDDEN, OUTPUT = 8, 25, [32, 32, 32], 512

    key = jax.random.PRNGKey(0)
    kx, kp = jax.random.split(key)
    x = jax.random.normal(kx, (B, INPUT), jnp.float32)

    raw = make_raw_params(kp, INPUT, HIDDEN, OUTPUT)
    fp = fold_and_pad(raw, INPUT, HIDDEN, OUTPUT)

    y = twl_forward(x, fp, output_size=OUTPUT)
    y = jax.block_until_ready(y)

    y_ref = twl_reference(x, raw, HIDDEN)
    assert y.shape == (B, OUTPUT)
    assert jnp.allclose(y, y_ref, atol=1e-4, rtol=1e-4)

    print("KERNEL_OK")
</pallas_src>

<mosaic_0001>
module attributes {stable_mosaic.version = 11 : i64} {
  func.func @fused_mlp_kernel(%arg0: memref<8x128xf32, #tpu.memory_space<vmem>>, %arg1: memref<128x128xf32, #tpu.memory_space<vmem>>, %arg2: memref<1x128xf32, #tpu.memory_space<vmem>>, %arg3: memref<128x128xf32, #tpu.memory_space<vmem>>, %arg4: memref<1x128xf32, #tpu.memory_space<vmem>>, %arg5: memref<128x128xf32, #tpu.memory_space<vmem>>, %arg6: memref<1x128xf32, #tpu.memory_space<vmem>>, %arg7: memref<128x512xf32, #tpu.memory_space<vmem>>, %arg8: memref<1x512xf32, #tpu.memory_space<vmem>>, %arg9: memref<8x512xf32, #tpu.memory_space<vmem>>) attributes {dimension_semantics = [], scalar_prefetch = 0 : i64, scratch_operands = 0 : i64, tpu.core_type = #tpu.core_type<tc>} {
    %c0 = arith.constant 0 : index
    %c0_0 = arith.constant 0 : index
    %0 = vector.load %arg0[%c0, %c0_0] : memref<8x128xf32, #tpu.memory_space<vmem>>, vector<8x128xf32>
    %c0_1 = arith.constant 0 : index
    %c0_2 = arith.constant 0 : index
    %1 = vector.load %arg1[%c0_1, %c0_2] : memref<128x128xf32, #tpu.memory_space<vmem>>, vector<128x128xf32>
    %cst = arith.constant dense<0.000000e+00> : vector<8x128xf32>
    %2 = tpu.matmul %0, %1, %cst {dimension_numbers = #tpu.dot_dimension_numbers<[1], [0], [0], [1], [0, 0, 1, 1], [], []>} : vector<8x128xf32>, vector<128x128xf32>, vector<8x128xf32> -> vector<8x128xf32>
    %c0_3 = arith.constant 0 : index
    %c0_4 = arith.constant 0 : index
    %3 = vector.load %arg2[%c0_3, %c0_4] : memref<1x128xf32, #tpu.memory_space<vmem>>, vector<1x128xf32>
    %4 = vector.broadcast %3 : vector<1x128xf32> to vector<8x128xf32>
    %5 = arith.addf %2, %4 : vector<8x128xf32>
    %cst_5 = arith.constant 0.000000e+00 : f32
    %6 = vector.broadcast %cst_5 : f32 to vector<8x128xf32>
    %7 = arith.maximumf %5, %6 : vector<8x128xf32>
    %c0_6 = arith.constant 0 : index
    %c0_7 = arith.constant 0 : index
    %8 = vector.load %arg3[%c0_6, %c0_7] : memref<128x128xf32, #tpu.memory_space<vmem>>, vector<128x128xf32>
    %cst_8 = arith.constant dense<0.000000e+00> : vector<8x128xf32>
    %9 = tpu.matmul %7, %8, %cst_8 {dimension_numbers = #tpu.dot_dimension_numbers<[1], [0], [0], [1], [0, 0, 1, 1], [], []>} : vector<8x128xf32>, vector<128x128xf32>, vector<8x128xf32> -> vector<8x128xf32>
    %c0_9 = arith.constant 0 : index
    %c0_10 = arith.constant 0 : index
    %10 = vector.load %arg4[%c0_9, %c0_10] : memref<1x128xf32, #tpu.memory_space<vmem>>, vector<1x128xf32>
    %11 = vector.broadcast %10 : vector<1x128xf32> to vector<8x128xf32>
    %12 = arith.addf %9, %11 : vector<8x128xf32>
    %cst_11 = arith.constant 0.000000e+00 : f32
    %13 = vector.broadcast %cst_11 : f32 to vector<8x128xf32>
    %14 = arith.maximumf %12, %13 : vector<8x128xf32>
    %c0_12 = arith.constant 0 : index
    %c0_13 = arith.constant 0 : index
    %15 = vector.load %arg5[%c0_12, %c0_13] : memref<128x128xf32, #tpu.memory_space<vmem>>, vector<128x128xf32>
    %cst_14 = arith.constant dense<0.000000e+00> : vector<8x128xf32>
    %16 = tpu.matmul %14, %15, %cst_14 {dimension_numbers = #tpu.dot_dimension_numbers<[1], [0], [0], [1], [0, 0, 1, 1], [], []>} : vector<8x128xf32>, vector<128x128xf32>, vector<8x128xf32> -> vector<8x128xf32>
    %c0_15 = arith.constant 0 : index
    %c0_16 = arith.constant 0 : index
    %17 = vector.load %arg6[%c0_15, %c0_16] : memref<1x128xf32, #tpu.memory_space<vmem>>, vector<1x128xf32>
    %18 = vector.broadcast %17 : vector<1x128xf32> to vector<8x128xf32>
    %19 = arith.addf %16, %18 : vector<8x128xf32>
    %cst_17 = arith.constant 0.000000e+00 : f32
    %20 = vector.broadcast %cst_17 : f32 to vector<8x128xf32>
    %21 = arith.maximumf %19, %20 : vector<8x128xf32>
    %c0_18 = arith.constant 0 : index
    %c0_19 = arith.constant 0 : index
    %22 = vector.load %arg7[%c0_18, %c0_19] : memref<128x512xf32, #tpu.memory_space<vmem>>, vector<128x512xf32>
    %cst_20 = arith.constant dense<0.000000e+00> : vector<8x512xf32>
    %23 = tpu.matmul %21, %22, %cst_20 {dimension_numbers = #tpu.dot_dimension_numbers<[1], [0], [0], [1], [0, 0, 1, 1], [], []>} : vector<8x128xf32>, vector<128x512xf32>, vector<8x512xf32> -> vector<8x512xf32>
    %c0_21 = arith.constant 0 : index
    %c0_22 = arith.constant 0 : index
    %24 = vector.load %arg8[%c0_21, %c0_22] : memref<1x512xf32, #tpu.memory_space<vmem>>, vector<1x512xf32>
    %25 = vector.broadcast %24 : vector<1x512xf32> to vector<8x512xf32>
    %26 = arith.addf %23, %25 : vector<8x512xf32>
    %c0_23 = arith.constant 0 : index
    %c0_24 = arith.constant 0 : index
    %27 = vector.load %arg9[%c0_23, %c0_24] : memref<8x512xf32, #tpu.memory_space<vmem>>, vector<8x512xf32>
    tpu.vector_store %arg9[%c0_23, %c0_24], %26 {strides = array<i32>} : memref<8x512xf32, #tpu.memory_space<vmem>>, vector<8x512xf32>,
    return
  }
}

</mosaic_0001>

<bundles_post_ra>
// kernel: twl_forward.1
= control target key start
LH: loop header
LB: loop body
LE: loop exit
PB: predicated region body
PF: predicated region fallthrough
CT: control target
= control target key end

     0   :  { %14 = vsyncpa [#allocation3], 0  ;;  %s1237_s0 = inlined_call_operand.vmem [shape: f32[8,128], index: 0, kind: input, shape index: {}]   ;;  %s1238_s1 = inlined_call_operand.hbm [shape: f32[128,128], index: 1, kind: input, shape index: {}]   ;;  %s1239_s2 = inlined_call_operand.vmem [shape: f32[1,128], index: 2, kind: input, shape index: {}]   ;;  %s1240_s3 = inlined_call_operand.hbm [shape: f32[128,128], index: 3, kind: input, shape index: {}]   ;;  %s1241_s4 = inlined_call_operand.vmem [shape: f32[1,128], index: 4, kind: input, shape index: {}]   ;;  %s1242_s5 = inlined_call_operand.hbm [shape: f32[128,128], index: 5, kind: input, shape index: {}]   ;;  %s1243_s6 = inlined_call_operand.vmem [shape: f32[1,128], index: 6, kind: input, shape index: {}]   ;;  %s1244_s7 = inlined_call_operand.hbm [shape: f32[128,512], index: 7, kind: input, shape index: {}]   ;;  %s1245_s8 = inlined_call_operand.vmem [shape: f32[1,512], index: 8, kind: input, shape index: {}]   ;;  %s1246_s9 = inlined_call_operand.hbm [shape: f32[8,512], index: 9, kind: output, shape index: {}]  }
   0x1   :  { %15 = vsyncpa [#allocation6], 0 }
   0x2   :  { %16 = vsyncpa [#allocation9], 0 }
   0x3   :  { %17 = vsyncpa [#allocation4], 0  ;;  %s1045_s30 = smov [#allocation5]   ;;  %s1046_s11 = smov [#allocation2]  }
   0x4   :  { %s39_s10 = sshll.u32 %s1045_s30, 4  ;;  %s25_s12 = sshll.u32 %s1046_s11, 4  ;;  %s40_s10 = int_to_ptr.vmem [resolvable:$true] %s39_s10  ;;  %s1107_s12 = int_to_ptr.vmem [resolvable:$true] %s25_s12 }
   0x5   :  { %s927_s15 = scalar_lea.hbm %s1240_s3, 2048 }
   0x6   :  { %p928_p0 = scmp.ne.s32.totalorder %s1240_s3, %s927_s15  ;;  %p931_p1 = scmp.lt.u32.totalorder %s927_s15, %s1240_s3 }
   0x8   :  { %p933_p2 = pnand %p931_p1, %p928_p0 }
   0xa   :  { %936 = shalt.err (!%p933_p2)
}
   0xb   :  { %s937_s20 = scalar_lea.vmem %s40_s10, 2048  ;;  %p942_p4 = scmp.lt.s32.totalorder %s40_s10, %s40_s10 }
   0xc   :  { %p938_p3 = scmp.ne.s32.totalorder %s40_s10, %s937_s20  ;;  %p943_p5 = scmp.lt.s32.totalorder %s937_s20, %s937_s20 }
   0xe   :  { %p944_p6 = por %p943_p5, %p942_p4 }
  0x10   :  { %p945_p7 = pnand %p944_p6, %p938_p3 }
  0x12   :  { %948 = shalt.err (!%p945_p7)
}
  0x13   :  { %s1047_s21 = smov 128   ;;  %s1048_s22 = smov 8  }
  0x14   :  { %45 = dma.hbm_to_vmem [thread:$0]  %s1240_s3, 2048, %s40_s10, [#allocation6], %s1047_s21, %s1047_s21, %s1048_s22  }
  0x15   :  { %s949_s27 = scalar_lea.hbm %s1238_s1, 2048 }
  0x16   :  { %p950_p8 = scmp.ne.s32.totalorder %s1238_s1, %s949_s27  ;;  %p953_p9 = scmp.lt.u32.totalorder %s949_s27, %s1238_s1 }
  0x18   :  { %p955_p10 = pnand %p953_p9, %p950_p8 }
  0x1a   :  { %958 = shalt.err (!%p955_p10)
}
  0x1b   :  { %s959_s13 = scalar_lea.vmem %s1107_s12, 2048  ;;  %p964_p12 = scmp.lt.s32.totalorder %s1107_s12, %s1107_s12 }
  0x1c   :  { %p960_p11 = scmp.ne.s32.totalorder %s1107_s12, %s959_s13  ;;  %p965_p13 = scmp.lt.s32.totalorder %s959_s13, %s959_s13 }
  0x1e   :  { %p966_p0 = por %p965_p13, %p964_p12 }
  0x20   :  { %p967_p1 = pnand %p966_p0, %p960_p11 }
  0x22   :  { %970 = shalt.err (!%p967_p1)
}
  0x23   :  { %31 = dma.hbm_to_vmem [thread:$0]  %s1238_s1, 2048, %s1107_s12, [#allocation3], %s1047_s21, %s1047_s21, %s1048_s22  }
  0x24   :  { %s1049_s14 = smov [#allocation7]   ;;  %s1050_s16 = smov [#allocation8]  }
  0x25   :  { %s53_s15 = sshll.u32 %s1049_s14, 4  ;;  %s67_s17 = sshll.u32 %s1050_s16, 4  ;;  %s54_s15 = int_to_ptr.vmem [resolvable:$true] %s53_s15  ;;  %s1144_s17 = int_to_ptr.vmem [resolvable:$true] %s67_s17 }
  0x26   :  { %s971_s20 = scalar_lea.hbm %s1242_s5, 2048 }
  0x27   :  { %p972_p2 = scmp.ne.s32.totalorder %s1242_s5, %s971_s20  ;;  %p975_p3 = scmp.lt.u32.totalorder %s971_s20, %s1242_s5 }
  0x29   :  { %p977_p4 = pnand %p975_p3, %p972_p2 }
  0x2b   :  { %980 = shalt.err (!%p977_p4)
}
  0x2c   :  { %s981_s1 = scalar_lea.vmem %s54_s15, 2048  ;;  %p986_p6 = scmp.lt.s32.totalorder %s54_s15, %s54_s15 }
  0x2d   :  { %p982_p5 = scmp.ne.s32.totalorder %s54_s15, %s981_s1  ;;  %p987_p7 = scmp.lt.s32.totalorder %s981_s1, %s981_s1 }
  0x2f   :  { %p988_p8 = por %p987_p7, %p986_p6 }
  0x31   :  { %p989_p9 = pnand %p988_p8, %p982_p5 }
  0x33   :  { %992 = shalt.err (!%p989_p9)
}
  0x34   :  { %59 = dma.hbm_to_vmem [thread:$0]  %s1242_s5, 2048, %s54_s15, [#allocation6], %s1047_s21, %s1047_s21, %s1048_s22  }
  0x35   :  { %s993_s30 = scalar_lea.hbm %s1244_s7, 8192 }
  0x36   :  { %p994_p10 = scmp.ne.s32.totalorder %s1244_s7, %s993_s30  ;;  %p997_p11 = scmp.lt.u32.totalorder %s993_s30, %s1244_s7 }
  0x38   :  { %p999_p12 = pnand %p997_p11, %p994_p10 }
  0x3a   :  { %1002 = shalt.err (!%p999_p12)
}
  0x3b   :  { %s1003_s14 = scalar_lea.vmem %s1144_s17, 8192  ;;  %p1008_p0 = scmp.lt.s32.totalorder %s1144_s17, %s1144_s17 }
  0x3c   :  { %p1004_p13 = scmp.ne.s32.totalorder %s1144_s17, %s1003_s14  ;;  %p1009_p1 = scmp.lt.s32.totalorder %s1003_s14, %s1003_s14 }
  0x3e   :  { %p1010_p2 = por %p1009_p1, %p1008_p0 }
  0x40   :  { %p1011_p3 = pnand %p1010_p2, %p1004_p13 }
  0x42   :  { %1014 = shalt.err (!%p1011_p3)
}
  0x43   :  { %s1051_s5 = smov 512   ;;  %s1052_s21 = smov 32  }
  0x44   :  { %73 = dma.hbm_to_vmem [thread:$0]  %s1244_s7, 8192, %s1144_s17, [#allocation9], %s1051_s5, %s1051_s5, %s1052_s21  }
  0x45   :  { %1037 = dma.done.wait [#allocation3], 2048  }
  0x46   :  { %1038 = vsyncadd [#allocation3], 4294965248 }
  0x47   :  { %1039 = dma.done.wait [#allocation6], 4096  }
  0x48   :  { %1040 = vsyncadd [#allocation6], 4294963200 }
  0x49   :  { %1041 = dma.done.wait [#allocation9], 8192  }
  0x4a   :  { %1042 = vsyncadd [#allocation9], 4294959104  ;;  %v1053_v0 = vmov 0.0|0.0   ;;  %vm1054_vm0 = vmmov 0   ;;  %v1055_v1 = vmov 0.0   ;;  %v89_v2 = vld [vmem:[#allocation2] sm:$0xff] }
  0x4b   :  { %779 = vmatprep.subr.bf16.mxu0 %v1053_v0  ;;  %706 = vmatprep.mubr.msk.f32.mxu0 %vm1054_vm0, %v1055_v1  ;;  %v90_v3 = vld [vmem:[#allocation2 + $0x8] sm:$0xff]  ;;  %v91_v4 = vld [vmem:[#allocation2 + $0x10] sm:$0xff]  ;;  %v92_v6 = vld [vmem:[#allocation2 + $0x18] sm:$0xff] }
  0x4c   :  { %803 = vmatprep.subr.bf16.mxu1 %v1053_v0  ;;  %741 = vmatprep.mubr.msk.f32.mxu1 %vm1054_vm0, %v1055_v1  ;;  %v780_v5 = vpack.c.bf16 %v90_v3, %v89_v2  ;;  %v783_v7 = vpack.c.bf16 %v92_v6, %v91_v4  ;;  %v93_v8 = vld [vmem:[#allocation2 + $0x20] sm:$0xff]  ;;  %v94_v9 = vld [vmem:[#allocation2 + $0x28] sm:$0xff]  ;;  %v185_v12 = vld [vmem:[#allocation5 + $0x10] sm:$0xff] }
  0x4d   :  { %v183_v10 = vld [vmem:[#allocation5] sm:$0xff]  ;;  %v184_v11 = vld [vmem:[#allocation5 + $0x8] sm:$0xff]  ;;  %v186_v13 = vld [vmem:[#allocation5 + $0x18] sm:$0xff]  ;;  %v786_v14 = vpack.c.bf16 %v94_v9, %v93_v8 }
  0x4e   :  { %781 = vmatpush3.bf16.msra.mxu0 %v780_v5  ;;  %v804_v15 = vpack.c.bf16 %v184_v11, %v183_v10  ;;  %v95_v16 = vld [vmem:[#allocation2 + $0x30] sm:$0xff]  ;;  %v96_v17 = vld [vmem:[#allocation2 + $0x38] sm:$0xff]  ;;  %v807_v18 = vpack.c.bf16 %v186_v13, %v185_v12  ;;  %v187_v19 = vld [vmem:[#allocation5 + $0x20] sm:$0xff] }
  0x4f   :  { %782 = vmatprep.subr.bf16.mxu0 %v1053_v0  ;;  %v188_v20 = vld [vmem:[#allocation5 + $0x28] sm:$0xff]  ;;  %v789_v21 = vpack.c.bf16 %v96_v17, %v95_v16  ;;  %v97_v22 = vld [vmem:[#allocation2 + $0x40] sm:$0xff]  ;;  %v189_v25 = vld [vmem:[#allocation5 + $0x30] sm:$0xff] }
  0x50   :  { %805 = vmatpush3.bf16.msra.mxu1 %v804_v15  ;;  %v98_v23 = vld [vmem:[#allocation2 + $0x48] sm:$0xff]  ;;  %v810_v24 = vpack.c.bf16 %v188_v20, %v187_v19  ;;  %v190_v26 = vld [vmem:[#allocation5 + $0x38] sm:$0xff]  ;;  %v99_v28 = vld [vmem:[#allocation2 + $0x50] sm:$0xff] }
  0x51   :  { %806 = vmatprep.subr.bf16.mxu1 %v1053_v0  ;;  %v792_v27 = vpack.c.bf16 %v98_v23, %v97_v22  ;;  %v100_v29 = vld [vmem:[#allocation2 + $0x58] sm:$0xff]  ;;  %v813_v30 = vpack.c.bf16 %v190_v26, %v189_v25  ;;  %v191_v31 = vld [vmem:[#allocation5 + $0x40] sm:$0xff]  ;;  %v192_v32 = vld [vmem:[#allocation5 + $0x48] sm:$0xff] }
  0x52   :  { %784 = vmatpush3.bf16.msra.mxu0 %v783_v7  ;;  %v795_v33 = vpack.c.bf16 %v100_v29, %v99_v28  ;;  %v101_v34 = vld [vmem:[#allocation2 + $0x60] sm:$0xff]  ;;  %v102_v35 = vld [vmem:[#allocation2 + $0x68] sm:$0xff]  ;;  %v816_v36 = vpack.c.bf16 %v192_v32, %v191_v31  ;;  %v193_v37 = vld [vmem:[#allocation5 + $0x50] sm:$0xff] }
  0x53   :  { %785 = vmatprep.subr.bf16.mxu0 %v1053_v0  ;;  %v194_v38 = vld [vmem:[#allocation5 + $0x58] sm:$0xff]  ;;  %v798_v39 = vpack.c.bf16 %v102_v35, %v101_v34  ;;  %v103_v40 = vld [vmem:[#allocation2 + $0x70] sm:$0xff]  ;;  %v195_v43 = vld [vmem:[#allocation5 + $0x60] sm:$0xff] }
  0x54   :  { %808 = vmatpush3.bf16.msra.mxu1 %v807_v18  ;;  %v104_v41 = vld [vmem:[#allocation2 + $0x78] sm:$0xff]  ;;  %v819_v42 = vpack.c.bf16 %v194_v38, %v193_v37  ;;  %v196_v44 = vld [vmem:[#allocation5 + $0x68] sm:$0xff]  ;;  %v197_v48 = vld [vmem:[#allocation5 + $0x70] sm:$0xff] }
  0x55   :  { %809 = vmatprep.subr.bf16.mxu1 %v1053_v0  ;;  %v801_v45 = vpack.c.bf16 %v104_v41, %v103_v40  ;;  %v822_v46 = vpack.c.bf16 %v196_v44, %v195_v43  ;;  %v88_v47 = vld [vmem:[%s1237_s0] sm:$0xff]  ;;  %v277_v51 = vld [vmem:[#allocation7] sm:$0xff]  ;;  %v278_v52 = vld [vmem:[#allocation7 + $0x8] sm:$0xff] }
  0x56   :  { %787 = vmatpush3.bf16.msra.mxu0 %v786_v14  ;;  %v198_v49 = vld [vmem:[#allocation5 + $0x78] sm:$0xff]  ;;  %v279_v53 = vld [vmem:[#allocation7 + $0x10] sm:$0xff]  ;;  %v828_v54 = vpack.c.bf16 %v278_v52, %v277_v51  ;;  %v281_v57 = vld [vmem:[#allocation7 + $0x20] sm:$0xff] }
  0x57   :  { %788 = vmatprep.subr.bf16.mxu0 %v1053_v0  ;;  %v825_v50 = vpack.c.bf16 %v198_v49, %v197_v48  ;;  %v280_v55 = vld [vmem:[#allocation7 + $0x18] sm:$0xff]  ;;  %v282_v58 = vld [vmem:[#allocation7 + $0x28] sm:$0xff]  ;;  %v283_v60 = vld [vmem:[#allocation7 + $0x30] sm:$0xff] }
  0x58   :  { %811 = vmatpush3.bf16.msra.mxu1 %v810_v24  ;;  %v831_v56 = vpack.c.bf16 %v280_v55, %v279_v53  ;;  %v834_v59 = vpack.c.bf16 %v282_v58, %v281_v57  ;;  %v284_v61 = vld [vmem:[#allocation7 + $0x38] sm:$0xff]  ;;  %v285_v63 = vld [vmem:[#allocation7 + $0x40] sm:$0xff]  ;;  %v286_v2 = vld [vmem:[#allocation7 + $0x48] sm:$0xff] }
  0x59   :  { %812 = vmatprep.subr.bf16.mxu1 %v1053_v0  ;;  %v837_v62 = vpack.c.bf16 %v284_v61, %v283_v60  ;;  %v840_v3 = vpack.c.bf16 %v286_v2, %v285_v63  ;;  %v287_v4 = vld [vmem:[#allocation7 + $0x50] sm:$0xff]  ;;  %v288_v5 = vld [vmem:[#allocation7 + $0x58] sm:$0xff]  ;;  %v289_v7 = vld [vmem:[#allocation7 + $0x60] sm:$0xff] }
  0x5a   :  { %790 = vmatpush3.bf16.msra.mxu0 %v789_v21  ;;  %v843_v6 = vpack.c.bf16 %v288_v5, %v287_v4  ;;  %v290_v8 = vld [vmem:[#allocation7 + $0x68] sm:$0xff]  ;;  %v620_v10 = vld [vmem:[%s1239_s2] ss:$0 sm:$0xff]  ;;  %v291_v15 = vld [vmem:[#allocation7 + $0x70] sm:$0xff] }
  0x5b   :  { %791 = vmatprep.subr.bf16.mxu0 %v1053_v0  ;;  %v846_v9 = vpack.c.bf16 %v290_v8, %v289_v7  ;;  %v292_v16 = vld [vmem:[#allocation7 + $0x78] sm:$0xff]  ;;  %v372_v18 = vld [vmem:[#allocation8 + $0x8] sm:$0xff]  ;;  %v371_v22 = vld [vmem:[#allocation8] sm:$0xff] }
  0x5c   :  { %814 = vmatpush3.bf16.msra.mxu1 %v813_v30  ;;  %v849_v17 = vpack.c.bf16 %v292_v16, %v291_v15  ;;  %v376_v19 = vld [vmem:[#allocation8 + $0x28] sm:$0xff]  ;;  %v374_v20 = vld [vmem:[#allocation8 + $0x18] sm:$0xff]  ;;  %v375_v23 = vld [vmem:[#allocation8 + $0x20] sm:$0xff] }
  0x5d   :  { %815 = vmatprep.subr.bf16.mxu1 %v1053_v0  ;;  %v851_v21 = vpack.c.bf16 %v376_v19, %v372_v18  ;;  %v853_v25 = vpack.c.bf16 %v375_v23, %v371_v22  ;;  %v380_v26 = vld [vmem:[#allocation8 + $0x48] sm:$0xff]  ;;  %v379_v29 = vld [vmem:[#allocation8 + $0x40] sm:$0xff]  ;;  %v373_v63 = vld [vmem:[#allocation8 + $0x10] sm:$0xff] }
  0x5e   :  { %793 = vmatpush3.bf16.msra.mxu0 %v792_v27  ;;  %v384_v27 = vld [vmem:[#allocation8 + $0x68] sm:$0xff]  ;;  %v383_v30 = vld [vmem:[#allocation8 + $0x60] sm:$0xff]  ;;  %v377_v2 = vld [vmem:[#allocation8 + $0x30] sm:$0xff] }
  0x5f   :  { %794 = vmatprep.subr.bf16.mxu0 %v1053_v0  ;;  %v855_v28 = vpack.c.bf16 %v384_v27, %v380_v26  ;;  %v857_v31 = vpack.c.bf16 %v383_v30, %v379_v29  ;;  %v388_v32 = vld [vmem:[#allocation8 + $0x88] sm:$0xff]  ;;  %v387_v35 = vld [vmem:[#allocation8 + $0x80] sm:$0xff]  ;;  %v382_v4 = vld [vmem:[#allocation8 + $0x58] sm:$0xff]  ;;  %v885_v8 = vpack.c.bf16 %v377_v2, %v373_v63 }
  0x60   :  { %817 = vmatpush3.bf16.msra.mxu1 %v816_v36  ;;  %v391_v36 = vld [vmem:[#allocation8 + $0xa0] sm:$0xff]  ;;  %v396_v38 = vld [vmem:[#allocation8 + $0xc8] sm:$0xff]  ;;  %v386_v5 = vld [vmem:[#allocation8 + $0x78] sm:$0xff] }
  0x61   :  { %818 = vmatprep.subr.bf16.mxu1 %v1053_v0  ;;  %v861_v37 = vpack.c.bf16 %v391_v36, %v387_v35  ;;  %v395_v41 = vld [vmem:[#allocation8 + $0xc0] sm:$0xff]  ;;  %v404_v44 = vld [vmem:[#allocation8 + $0x108] sm:$0xff]  ;;  %v393_v18 = vld [vmem:[#allocation8 + $0xb0] sm:$0xff] }
  0x62   :  { %796 = vmatpush3.bf16.msra.mxu0 %v795_v33  ;;  %v392_v33 = vld [vmem:[#allocation8 + $0xa8] sm:$0xff]  ;;  %v407_v48 = vld [vmem:[#allocation8 + $0x120] sm:$0xff]  ;;  %v398_v19 = vld [vmem:[#allocation8 + $0xd8] sm:$0xff] }
  0x63   :  { %797 = vmatprep.subr.bf16.mxu0 %v1053_v0  ;;  %v859_v34 = vpack.c.bf16 %v392_v33, %v388_v32  ;;  %v416_v51 = vld [vmem:[#allocation8 + $0x168] sm:$0xff]  ;;  %v411_v53 = vld [vmem:[#allocation8 + $0x140] sm:$0xff]  ;;  %v397_v22 = vld [vmem:[#allocation8 + $0xd0] sm:$0xff] }
  0x64   :  { %820 = vmatpush3.bf16.msra.mxu1 %v819_v42  ;;  %v399_v42 = vld [vmem:[#allocation8 + $0xe0] sm:$0xff]  ;;  %v424_v57 = vld [vmem:[#allocation8 + $0x1a8] sm:$0xff]  ;;  %v401_v23 = vld [vmem:[#allocation8 + $0xf0] sm:$0xff] }
  0x65   :  { %821 = vmatprep.subr.bf16.mxu1 %v1053_v0  ;;  %v865_v43 = vpack.c.bf16 %v399_v42, %v395_v41  ;;  %v423_v60 = vld [vmem:[#allocation8 + $0x1a0] sm:$0xff]  ;;  %v897_v26 = vpack.c.bf16 %v401_v23, %v397_v22  ;;  %v414_v29 = vld [vmem:[#allocation8 + $0x158] sm:$0xff]  ;;  %v413_v33 = vld [vmem:[#allocation8 + $0x150] sm:$0xff] }
  0x66   :  { %799 = vmatpush3.bf16.msra.mxu0 %v798_v39  ;;  %v400_v39 = vld [vmem:[#allocation8 + $0xe8] sm:$0xff]  ;;  %v418_v30 = vld [vmem:[#allocation8 + $0x178] sm:$0xff] }
  0x67   :  { %800 = vmatprep.subr.bf16.mxu0 %v1053_v0  ;;  %v863_v40 = vpack.c.bf16 %v400_v39, %v396_v38  ;;  %v903_v32 = vpack.c.bf16 %v418_v30, %v414_v29  ;;  %v422_v35 = vld [vmem:[#allocation8 + $0x198] sm:$0xff]  ;;  %v421_v39 = vld [vmem:[#allocation8 + $0x190] sm:$0xff]  ;;  %v428_v42 = vld [vmem:[#allocation8 + $0x1c8] sm:$0xff] }
  0x68   :  { %823 = vmatpush3.bf16.msra.mxu1 %v822_v46  ;;  %v426_v36 = vld [vmem:[#allocation8 + $0x1b8] sm:$0xff] }
  0x69   :  { %824 = vmatprep.subr.bf16.mxu1 %v1053_v0  ;;  %v907_v38 = vpack.c.bf16 %v426_v36, %v422_v35  ;;  %v435_v63 = vld [vmem:[%s1245_s8] sm:$0xf] }
  0x6a   :  { %802 = vmatpush3.bf16.msra.mxu0 %v801_v45  ;;  %v408_v45 = vld [vmem:[#allocation8 + $0x128] sm:$0xff] }
  0x6b   :  { %827 = vmatprep.subr.bf16.mxu0 %v1053_v0  ;;  %v867_v46 = vpack.c.bf16 %v408_v45, %v404_v44  ;;  %v430_v44 = vld [vmem:[#allocation8 + $0x1d8] sm:$0xff] }
  0x6c   :  { %826 = vmatpush3.bf16.msra.mxu1 %v825_v50  ;;  %v412_v50 = vld [vmem:[#allocation8 + $0x148] sm:$0xff] }
  0x6d   :  { %707 = vmatmul.mubr.f32.vlgmr.msra.gmra.mrb[0].mxu0 %v88_v47  ;;  %852 = vmatprep.subr.bf16.mxu1 %v851_v21  ;;  %v403_v47 = vld [vmem:[#allocation8 + $0x100] sm:$0xff]  ;;  %v871_v52 = vpack.c.bf16 %v416_v51, %v412_v50  ;;  %v429_v51 = vld [vmem:[#allocation8 + $0x1d0] sm:$0xff] }
  0x6e   :  { %776 = vmatprep.mubr.msk.f32.mxu0 %vm1054_vm0, %v1055_v1  ;;  %829 = vmatpush3.bf16.msra.mxu0 %v828_v54  ;;  %v869_v49 = vpack.c.bf16 %v407_v48, %v403_v47  ;;  %v415_v54 = vld [vmem:[#allocation8 + $0x160] sm:$0xff] }
  0x6f   :  { %830 = vmatprep.subr.bf16.mxu0 %v1053_v0  ;;  %v873_v55 = vpack.c.bf16 %v415_v54, %v411_v53  ;;  %v427_v47 = vld [vmem:[#allocation8 + $0x1c0] sm:$0xff]  ;;  %v622_v54 = vld [vmem:[%s1243_s6] ss:$0 sm:$0xff]  ;;  %s1056_s6 = smov [#allocation10]  }
  0x70   :  { %v431_v48 = vld [vmem:[#allocation8 + $0x1e0] sm:$0xff]  ;;  %s609_s24 = sshll.u32 %s1056_s6, 4  ;;  %s610_s24 = int_to_ptr.vmem [resolvable:$true] %s609_s24 }
  0x71   :  { %v881_v50 = vpack.c.bf16 %v431_v48, %v427_v47  ;;  %s1015_s8 = scalar_lea.vmem %s610_s24, 512  ;;  %p1020_p5 = scmp.lt.s32.totalorder %s610_s24, %s610_s24 }
  0x72   :  { %832 = vmatpush3.bf16.msra.mxu0 %v831_v56  ;;  %v420_v56 = vld [vmem:[#allocation8 + $0x188] sm:$0xff]  ;;  %p1016_p4 = scmp.ne.s32.totalorder %s610_s24, %s1015_s8  ;;  %p1021_p6 = scmp.lt.s32.totalorder %s1015_s8, %s1015_s8 }
  0x73   :  { %833 = vmatprep.subr.bf16.mxu0 %v1053_v0  ;;  %v875_v58 = vpack.c.bf16 %v424_v57, %v420_v56 }
  0x74   :  { %p1022_p7 = por %p1021_p6, %p1020_p5 }
  0x76   :  { %835 = vmatpush3.bf16.msra.mxu0 %v834_v59  ;;  %v419_v59 = vld [vmem:[#allocation8 + $0x180] sm:$0xff]  ;;  %p1023_p8 = pnand %p1022_p7, %p1016_p4 }
  0x77   :  { %836 = vmatprep.subr.bf16.mxu0 %v1053_v0  ;;  %v877_v61 = vpack.c.bf16 %v423_v60, %v419_v59  ;;  %v437_v59 = vlaneseq }
  0x79   :  { %v438_v60 = vshrl.u32 %v437_v59, 7 }
  0x7a   :  { %838 = vmatpush3.bf16.msra.mxu0 %v837_v62  ;;  %v621_v62 = vld [vmem:[%s1241_s4] ss:$0 sm:$0xff] }
  0x7b   :  { %839 = vmatprep.subr.bf16.mxu0 %v1053_v0  ;;  %v443_v2 = vsub.s32 1, %v438_v60 }
  0x7e   :  { %841 = vmatpush3.bf16.msra.mxu0 %v840_v3 }
  0x7f   :  { %842 = vmatprep.subr.bf16.mxu0 %v1053_v0 }
  0x82   :  { %844 = vmatpush3.bf16.msra.mxu0 %v843_v6 }
  0x83   :  { %845 = vmatprep.subr.bf16.mxu0 %v1053_v0 }
  0x86   :  { %847 = vmatpush3.bf16.msra.mxu0 %v846_v9 }
  0x87   :  { %848 = vmatprep.subr.bf16.mxu0 %v1053_v0  ;;  %v378_v0 = vld [vmem:[#allocation8 + $0x38] sm:$0xff] }
  0x88   :  { %v883_v24 = vpack.c.bf16 %v378_v0, %v374_v20  ;;  %v402_v20 = vld [vmem:[#allocation8 + $0xf8] sm:$0xff] }
  0x89   :  { %v895_v0 = vpack.c.bf16 %v402_v20, %v398_v19 }
  0x8a   :  { %850 = vmatpush3.bf16.msra.mxu0 %v849_v17  ;;  %v389_v17 = vld [vmem:[#allocation8 + $0x90] sm:$0xff] }
  0x8b   :  { %884 = vmatprep.subr.bf16.mxu0 %v883_v24  ;;  %v893_v21 = vpack.c.bf16 %v393_v18, %v389_v17  ;;  %v406_v24 = vld [vmem:[#allocation8 + $0x118] sm:$0xff] }
 0x140   :  { %v178_v11 = vpop.f32.mrb[0].mxu0 }
 0x141   :  { %v179_v12 = vadd.f32 %v620_v10, %v178_v11  ;;  %v708_v13 = vpop.f32.mrb[1].mxu0  ;;  %v887_v10 = vpack.c.bf16 %v386_v5, %v382_v4  ;;  %v381_v11 = vld [vmem:[#allocation8 + $0x50] sm:$0xff] }
 0x142   :  { %v390_v13 = vld [vmem:[#allocation8 + $0x98] sm:$0xff] }
 0x143   :  { %v182_v14 = vmax.f32 %v179_v12, 0.0  ;;  %v385_v12 = vld [vmem:[#allocation8 + $0x70] sm:$0xff] }
 0x144   :  { %v889_v15 = vpack.c.bf16 %v385_v12, %v381_v11 }
 0x145   :  { %742 = vmatmul.mubr.f32.vlgmr.msra.gmra.mrb[0].mxu1 %v182_v14  ;;  %v394_v14 = vld [vmem:[#allocation8 + $0xb8] sm:$0xff] }
 0x146   :  { %521 = vmatprep.mubr.f32.mxu1 %v1055_v1  ;;  %854 = vmatpush1.bf16.msra.mxu1 %v853_v25  ;;  %v891_v16 = vpack.c.bf16 %v394_v14, %v390_v13  ;;  %v410_v25 = vld [vmem:[#allocation8 + $0x138] sm:$0xff] }
 0x147   :  { %856 = vmatprep.subr.bf16.mxu1 %v855_v28  ;;  %v899_v27 = vpack.c.bf16 %v410_v25, %v406_v24  ;;  %v405_v28 = vld [vmem:[#allocation8 + $0x110] sm:$0xff] }
 0x14a   :  { %858 = vmatpush1.bf16.msra.mxu1 %v857_v31 }
 0x14b   :  { %860 = vmatprep.subr.bf16.mxu1 %v859_v34  ;;  %v417_v34 = vld [vmem:[#allocation8 + $0x170] sm:$0xff] }
 0x14e   :  { %862 = vmatpush1.bf16.msra.mxu1 %v861_v37  ;;  %v905_v37 = vpack.c.bf16 %v417_v34, %v413_v33 }
 0x14f   :  { %864 = vmatprep.subr.bf16.mxu1 %v863_v40  ;;  %v425_v40 = vld [vmem:[#allocation8 + $0x1b0] sm:$0xff] }
 0x150   :  { %v909_v41 = vpack.c.bf16 %v425_v40, %v421_v39 }
 0x152   :  { %866 = vmatpush1.bf16.msra.mxu1 %v865_v43  ;;  %v432_v43 = vld [vmem:[#allocation8 + $0x1e8] sm:$0xff] }
 0x153   :  { %868 = vmatprep.subr.bf16.mxu1 %v867_v46  ;;  %v879_v45 = vpack.c.bf16 %v432_v43, %v428_v42  ;;  %v434_v46 = vld [vmem:[#allocation8 + $0x1f8] sm:$0xff] }
 0x156   :  { %870 = vmatpush1.bf16.msra.mxu1 %v869_v49  ;;  %v911_v49 = vpack.c.bf16 %v434_v46, %v430_v44 }
 0x157   :  { %872 = vmatprep.subr.bf16.mxu1 %v871_v52  ;;  %v433_v52 = vld [vmem:[#allocation8 + $0x1f0] sm:$0xff] }
 0x158   :  { %v913_v53 = vpack.c.bf16 %v433_v52, %v429_v51 }
 0x15a   :  { %874 = vmatpush1.bf16.msra.mxu1 %v873_v55 }
 0x15b   :  { %876 = vmatprep.subr.bf16.mxu1 %v875_v58 }
 0x15e   :  { %878 = vmatpush1.bf16.msra.mxu1 %v877_v61  ;;  %v439_v61 = vsub.s32 0, %v438_v60 }
 0x15f   :  { %880 = vmatprep.subr.bf16.mxu1 %v879_v45 }
 0x160   :  { %v440_v4 = vrot.slane %v435_v63, %v439_v61 }
 0x162   :  { %882 = vmatpush1.bf16.msra.mxu1 %v881_v50 }
 0x218   :  { %v272_v3 = vpop.f32.mrb[0].mxu1 }
 0x219   :  { %v273_v6 = vadd.f32 %v621_v62, %v272_v3  ;;  %v743_v7 = vpop.f32.mrb[1].mxu1  ;;  %v447_v62 = vsub.s32 2, %v438_v60  ;;  %v451_v3 = vsub.s32 3, %v438_v60 }
 0x21b   :  { %v276_v9 = vmax.f32 %v273_v6, 0.0  ;;  %v448_v5 = vrot.slane %v435_v63, %v447_v62  ;;  %v444_v6 = vrot.slane %v435_v63, %v443_v2  ;;  %v452_v7 = vrot.slane %v435_v63, %v451_v3 }
 0x21d   :  { %777 = vmatmul.mubr.f32.vlgmr.msra.gmra.mrb[2].mxu0 %v276_v9 }
 0x21e   :  { %886 = vmatpush1.bf16.msra.mxu0 %v885_v8  ;;  %592 = vmatprep.mubr.f32.mxu0 %v1055_v1  ;;  %v409_v1 = vld [vmem:[#allocation8 + $0x130] sm:$0xff] }
 0x21f   :  { %888 = vmatprep.subr.bf16.mxu0 %v887_v10  ;;  %v901_v31 = vpack.c.bf16 %v409_v1, %v405_v28 }
 0x222   :  { %890 = vmatpush1.bf16.msra.mxu0 %v889_v15 }
 0x223   :  { %892 = vmatprep.subr.bf16.mxu0 %v891_v16 }
 0x226   :  { %894 = vmatpush1.bf16.msra.mxu0 %v893_v21 }
 0x227   :  { %896 = vmatprep.subr.bf16.mxu0 %v895_v0 }
 0x22a   :  { %898 = vmatpush1.bf16.msra.mxu0 %v897_v26 }
 0x22b   :  { %900 = vmatprep.subr.bf16.mxu0 %v899_v27 }
 0x22e   :  { %902 = vmatpush1.bf16.msra.mxu0 %v901_v31 }
 0x22f   :  { %904 = vmatprep.subr.bf16.mxu0 %v903_v32 }
 0x232   :  { %906 = vmatpush1.bf16.msra.mxu0 %v905_v37 }
 0x233   :  { %908 = vmatprep.subr.bf16.mxu0 %v907_v38 }
 0x236   :  { %910 = vmatpush1.bf16.msra.mxu0 %v909_v41 }
 0x237   :  { %912 = vmatprep.subr.bf16.mxu0 %v911_v49 }
 0x23a   :  { %914 = vmatpush1.bf16.msra.mxu0 %v913_v53 }
 0x2f0   :  { %v366_v55 = vpop.f32.mrb[2].mxu0 }
 0x2f1   :  { %v367_v56 = vadd.f32 %v622_v54, %v366_v55  ;;  %v778_v57 = vpop.f32.mrb[3].mxu0 }
 0x2f3   :  { %v370_v58 = vmax.f32 %v367_v56, 0.0 }
 0x2f5   :  { %522 = vmatmul.mubr.f32.vlgmr.msra.gmra.mrb[2].mxu1 %v370_v58  ;;  %593 = vmatmul.mubr.f32.vlgmr.msra.gmra.mrb[4].mxu0 %v370_v58 }
 0x3c8   :  { %v523_v8 = vpop.f32.mrb[2].mxu1  ;;  %v594_v9 = vpop.f32.mrb[4].mxu0 }
 0x3c9   :  { %v524_v10 = vadd.f32 %v523_v8, %v440_v4  ;;  %v595_v11 = vadd.f32 %v594_v9, %v448_v5  ;;  %v525_v12 = vpop.f32.mrb[3].mxu1  ;;  %v596_v13 = vpop.f32.mrb[5].mxu0 }
 0x3ca   :  { %v526_v14 = vadd.f32 %v525_v12, %v444_v6  ;;  %v597_v15 = vadd.f32 %v596_v13, %v452_v7 }
 0x3cb   :  { %599 = vst [vmem:[#allocation10] sm:$0xff] %v524_v10  ;;  %601 = vst [vmem:[#allocation10 + $0x10] sm:$0xff] %v595_v11 }
 0x3cc   :  { %600 = vst [vmem:[#allocation10 + $0x8] sm:$0xff] %v526_v14  ;;  %602 = vst [vmem:[#allocation10 + $0x18] sm:$0xff] %v597_v15 }
 0x3cd   :  { %1026 = shalt.err (!%p1023_p8)
}
 0x3ce   :  { %s1027_s1 = scalar_lea.hbm %s1246_s9, 512 }
 0x3cf   :  { %p1028_p9 = scmp.ne.s32.totalorder %s1246_s9, %s1027_s1  ;;  %p1031_p10 = scmp.lt.u32.totalorder %s1027_s1, %s1246_s9 }
 0x3d1   :  { %p1033_p11 = pnand %p1031_p10, %p1028_p9 }
 0x3d3   :  { %1036 = shalt.err (!%p1033_p11)
}
 0x3d4   :  { %612 = dma.vmem_to_hbm [thread:$0]  %s610_s24, 512, %s1246_s9, [#allocation4]  }
 0x3d5   :  { %1043 = dma.done.wait [#allocation4], 512  }
 0x3d6   :  { %1044 = vsyncadd [#allocation4], 4294966784 }
 0x3d7   :  { %616 = vsyncpa [#allocation3], 1 }
 0x3d8   :  { %617 = vsyncpa [#allocation6], 1 }
 0x3d9   :  { %618 = vsyncpa [#allocation9], 1 }
 0x3da   :  { %619 = vsyncpa [#allocation4], 1 }

</bundles_post_ra>
